<compile_context>
chip_gen: v7x
topology: tpu7x:2x2x1
jax: 0.10.0
libtpu: 0.0.40
codegen_flags: <defaults>
</compile_context>

<pallas_src>
import functools

import jax
import jax.numpy as jnp
from jax.experimental import pallas as pl
from jax.experimental.pallas import tpu as pltpu

_LANE = 128      # vreg lane width (last dim)
_SUBLANE = 8     # vreg sublane granule (second-to-last dim, f32)


def _round_up(n, m):
    return ((n + m - 1) // m) * m


def _mlp_kernel(x_ref, w1_ref, b1_ref, w2_ref, b2_ref, o_ref):
    """One batch tile: o = relu(x @ W1 + b1) @ W2 + b2 (feature dims lane-padded)."""
    h = jnp.dot(x_ref[...], w1_ref[...], preferred_element_type=jnp.float32)
    h = jnp.maximum(h + b1_ref[...], 0.0)          # b1 is (1, hid_pad) -> broadcasts
    out = jnp.dot(h, w2_ref[...], preferred_element_type=jnp.float32)
    o_ref[...] = (out + b2_ref[...]).astype(o_ref.dtype)


def prepare_params(w1, b1, w2, b2):
    """One-time parameter prep (NOT per forward call).

    - Transpose PyTorch nn.Linear [out, in] weights to [in, out] so the kernel
      does a plain x @ W on the MXU.
    - Zero-pad hidden/output feature dims up to a multiple of 128 so both
      matmuls and the output store are lane-dense. Padded columns are zeros,
      so they contribute exactly 0 to the real outputs.
    Returns (padded params tuple, true output_size).
    """
    hidden, in_size = w1.shape
    out_size = w2.shape[0]
    hid_pad = _round_up(hidden, _LANE)
    out_pad = _round_up(out_size, _LANE)

    w1_p = jnp.zeros((in_size, hid_pad), jnp.float32).at[:, :hidden].set(
        w1.T.astype(jnp.float32))
    b1_p = jnp.zeros((1, hid_pad), jnp.float32).at[:, :hidden].set(
        b1.astype(jnp.float32)[None, :])
    w2_p = jnp.zeros((hid_pad, out_pad), jnp.float32).at[:hidden, :out_size].set(
        w2.T.astype(jnp.float32))
    b2_p = jnp.zeros((1, out_pad), jnp.float32).at[:, :out_size].set(
        b2.astype(jnp.float32)[None, :])
    return (w1_p, b1_p, w2_p, b2_p), out_size


def _forward_padded(x_pad, w1_p, b1_p, w2_p, b2_p, *, tile_b):
    b_pad, in_size = x_pad.shape
    hid_pad = w1_p.shape[1]
    out_pad = w2_p.shape[1]
    grid = (b_pad // tile_b,)

    # Explicit VMEM budget: resident weights/biases + double-buffered x/out
    # tiles + the f32 hidden intermediate, plus headroom. Sized so it also
    # fits v7x's smaller VMEM; capped below the 128 MiB of v5e/v6e.
    weight_bytes = 4 * (w1_p.size + b1_p.size + w2_p.size + b2_p.size)
    tile_bytes = 4 * 2 * tile_b * (in_size + out_pad)   # 2x for double-buffering
    scratch_bytes = 4 * tile_b * hid_pad
    vmem_limit = min(int(weight_bytes + tile_bytes + scratch_bytes) + (8 << 20),
                     112 << 20)

    const = lambda i: (0, 0)   # weights/biases: same block every step -> stay resident
    return pl.pallas_call(
        _mlp_kernel,
        out_shape=jax.ShapeDtypeStruct((b_pad, out_pad), x_pad.dtype),
        grid=grid,
        in_specs=[
            pl.BlockSpec((tile_b, in_size), lambda i: (i, 0)),   # x: tiled over batch
            pl.BlockSpec((in_size, hid_pad), const),             # W1 (resident)
            pl.BlockSpec((1, hid_pad), const),                   # b1 (resident)
            pl.BlockSpec((hid_pad, out_pad), const),             # W2 (resident)
            pl.BlockSpec((1, out_pad), const),                   # b2 (resident)
        ],
        out_specs=pl.BlockSpec((tile_b, out_pad), lambda i: (i, 0)),
        compiler_params=pltpu.CompilerParams(
            dimension_semantics=("parallel",),   # v7x: shard batch tiles across 2 TCs
            vmem_limit_bytes=vmem_limit,
        ),
    )(x_pad, w1_p, b1_p, w2_p, b2_p)


@functools.partial(jax.jit, static_argnames=("out_size", "max_tile_b"))
def linear_q_forward(x, params, out_size, max_tile_b=512):
    """Forward pass: y = relu(x @ W1 + b1) @ W2 + b2, using prepared params.

    x      : [B, input_size]
    params : output of prepare_params (pre-transposed, lane-padded, f32)
    returns: [B, out_size] in x.dtype
    """
    w1_p, b1_p, w2_p, b2_p = params
    b = x.shape[0]

    # Batch tile: as large as possible up to max_tile_b (good HBM-roofline
    # utilization), rounded to the 8-row sublane granule.
    tile_b = min(_round_up(b, _SUBLANE), max_tile_b)
    b_pad = _round_up(b, tile_b)

    x_pad = x.astype(jnp.float32)
    if b_pad != b:
        x_pad = jnp.pad(x_pad, ((0, b_pad - b), (0, 0)))

    y_pad = _forward_padded(x_pad, w1_p, b1_p, w2_p, b2_p, tile_b=tile_b)
    return y_pad[:b, :out_size].astype(x.dtype)


if __name__ == "__main__":
    # Small shapes consistent with the module (e.g. Snake DQN-style state).
    batch = 8
    input_size = 16
    hidden_size = 32
    output_size = 4

    key = jax.random.PRNGKey(0)
    kx, kw1, kb1, kw2, kb2 = jax.random.split(key, 5)

    x = jax.random.normal(kx, (batch, input_size), dtype=jnp.float32)

    # Deterministic synthetic parameters (PyTorch nn.Linear layout: [out, in]).
    w1 = jax.random.normal(kw1, (hidden_size, input_size), dtype=jnp.float32) * 0.1
    b1 = jax.random.normal(kb1, (hidden_size,), dtype=jnp.float32) * 0.1
    w2 = jax.random.normal(kw2, (output_size, hidden_size), dtype=jnp.float32) * 0.1
    b2 = jax.random.normal(kb2, (output_size,), dtype=jnp.float32) * 0.1

    # One-time prep (transpose + lane padding) — NOT part of the per-call hot path.
    params, out_size = prepare_params(w1, b1, w2, b2)

    y = linear_q_forward(x, params, out_size)
    y = jax.block_until_ready(y)

    # Pure-JAX reference for correctness.
    ref = jnp.maximum(x @ w1.T + b1, 0.0) @ w2.T + b2
    assert y.shape == (batch, output_size)
    assert jnp.allclose(y, ref, atol=1e-5, rtol=1e-5)

    print("KERNEL_OK")
</pallas_src>

<mosaic_0001>
module attributes {stable_mosaic.version = 11 : i64} {
  func.func @_mlp_kernel(%arg0: i32, %arg1: memref<8x16xf32, #tpu.memory_space<vmem>>, %arg2: memref<16x128xf32, #tpu.memory_space<vmem>>, %arg3: memref<1x128xf32, #tpu.memory_space<vmem>>, %arg4: memref<128x128xf32, #tpu.memory_space<vmem>>, %arg5: memref<1x128xf32, #tpu.memory_space<vmem>>, %arg6: memref<8x128xf32, #tpu.memory_space<vmem>>) attributes {dimension_semantics = [#tpu.dimension_semantics<parallel>], iteration_bounds = array<i64: 1>, scalar_prefetch = 0 : i64, scratch_operands = 0 : i64, tpu.core_type = #tpu.core_type<tc>, window_params = [{transform_indices = @transform_0, window_bounds = array<i64: 8, 16>}, {pipeline_mode = #tpu.pipeline_mode<synchronous>, transform_indices = @transform_1, window_bounds = array<i64: 16, 128>}, {pipeline_mode = #tpu.pipeline_mode<synchronous>, transform_indices = @transform_2, window_bounds = array<i64: 1, 128>}, {pipeline_mode = #tpu.pipeline_mode<synchronous>, transform_indices = @transform_3, window_bounds = array<i64: 128, 128>}, {pipeline_mode = #tpu.pipeline_mode<synchronous>, transform_indices = @transform_4, window_bounds = array<i64: 1, 128>}, {transform_indices = @transform_5, window_bounds = array<i64: 8, 128>}]} {
    %c0 = arith.constant 0 : index
    %c0_0 = arith.constant 0 : index
    %0 = vector.load %arg1[%c0, %c0_0] : memref<8x16xf32, #tpu.memory_space<vmem>>, vector<8x16xf32>
    %c0_1 = arith.constant 0 : index
    %c0_2 = arith.constant 0 : index
    %1 = vector.load %arg2[%c0_1, %c0_2] : memref<16x128xf32, #tpu.memory_space<vmem>>, vector<16x128xf32>
    %cst = arith.constant dense<0.000000e+00> : vector<8x128xf32>
    %2 = tpu.matmul %0, %1, %cst {dimension_numbers = #tpu.dot_dimension_numbers<[1], [0], [0], [1], [0, 0, 1, 1], [], []>} : vector<8x16xf32>, vector<16x128xf32>, vector<8x128xf32> -> vector<8x128xf32>
    %c0_3 = arith.constant 0 : index
    %c0_4 = arith.constant 0 : index
    %3 = vector.load %arg3[%c0_3, %c0_4] : memref<1x128xf32, #tpu.memory_space<vmem>>, vector<1x128xf32>
    %4 = vector.broadcast %3 : vector<1x128xf32> to vector<8x128xf32>
    %5 = arith.addf %2, %4 : vector<8x128xf32>
    %cst_5 = arith.constant 0.000000e+00 : f32
    %6 = vector.broadcast %cst_5 : f32 to vector<8x128xf32>
    %7 = arith.maximumf %5, %6 : vector<8x128xf32>
    %c0_6 = arith.constant 0 : index
    %c0_7 = arith.constant 0 : index
    %8 = vector.load %arg4[%c0_6, %c0_7] : memref<128x128xf32, #tpu.memory_space<vmem>>, vector<128x128xf32>
    %cst_8 = arith.constant dense<0.000000e+00> : vector<8x128xf32>
    %9 = tpu.matmul %7, %8, %cst_8 {dimension_numbers = #tpu.dot_dimension_numbers<[1], [0], [0], [1], [0, 0, 1, 1], [], []>} : vector<8x128xf32>, vector<128x128xf32>, vector<8x128xf32> -> vector<8x128xf32>
    %c0_9 = arith.constant 0 : index
    %c0_10 = arith.constant 0 : index
    %10 = vector.load %arg5[%c0_9, %c0_10] : memref<1x128xf32, #tpu.memory_space<vmem>>, vector<1x128xf32>
    %11 = vector.broadcast %10 : vector<1x128xf32> to vector<8x128xf32>
    %12 = arith.addf %9, %11 : vector<8x128xf32>
    %c0_11 = arith.constant 0 : index
    %c0_12 = arith.constant 0 : index
    %13 = vector.load %arg6[%c0_11, %c0_12] : memref<8x128xf32, #tpu.memory_space<vmem>>, vector<8x128xf32>
    tpu.vector_store %arg6[%c0_11, %c0_12], %12 {strides = array<i32>} : memref<8x128xf32, #tpu.memory_space<vmem>>, vector<8x128xf32>,
    return
  }
  func.func @transform_0(%arg0: i32) -> (i32, i32) {
    %c0_i32 = arith.constant 0 : i32
    %c0_i32_0 = arith.constant 0 : i32
    return %arg0, %c0_i32 : i32, i32
  }
  func.func @transform_1(%arg0: i32) -> (i32, i32) {
    %c0_i32 = arith.constant 0 : i32
    %c0_i32_0 = arith.constant 0 : i32
    %c0_i32_1 = arith.constant 0 : i32
    return %c0_i32, %c0_i32_0 : i32, i32
  }
  func.func @transform_2(%arg0: i32) -> (i32, i32) {
    %c0_i32 = arith.constant 0 : i32
    %c0_i32_0 = arith.constant 0 : i32
    %c0_i32_1 = arith.constant 0 : i32
    return %c0_i32, %c0_i32_0 : i32, i32
  }
  func.func @transform_3(%arg0: i32) -> (i32, i32) {
    %c0_i32 = arith.constant 0 : i32
    %c0_i32_0 = arith.constant 0 : i32
    %c0_i32_1 = arith.constant 0 : i32
    return %c0_i32, %c0_i32_0 : i32, i32
  }
  func.func @transform_4(%arg0: i32) -> (i32, i32) {
    %c0_i32 = arith.constant 0 : i32
    %c0_i32_0 = arith.constant 0 : i32
    %c0_i32_1 = arith.constant 0 : i32
    return %c0_i32, %c0_i32_0 : i32, i32
  }
  func.func @transform_5(%arg0: i32) -> (i32, i32) {
    %c0_i32 = arith.constant 0 : i32
    %c0_i32_0 = arith.constant 0 : i32
    return %arg0, %c0_i32 : i32, i32
  }
}

</mosaic_0001>

<bundles_post_ra>
// kernel: linear_q_forward.1
= control target key start
LH: loop header
LB: loop body
LE: loop exit
PB: predicated region body
PF: predicated region fallthrough
CT: control target
= control target key end

     0   :  { %10 = vsyncpa [#allocation3], 0  ;;  %s503_s0 = inlined_call_operand.hbm [shape: f32[8,16], index: 0, kind: input, shape index: {}]   ;;  %s504_s1 = inlined_call_operand.hbm [shape: f32[16,128], index: 1, kind: input, shape index: {}]   ;;  %s505_s2 = inlined_call_operand.vmem [shape: f32[1,128], index: 2, kind: input, shape index: {}]   ;;  %s506_s3 = inlined_call_operand.hbm [shape: f32[128,128], index: 3, kind: input, shape index: {}]   ;;  %s507_s4 = inlined_call_operand.vmem [shape: f32[1,128], index: 4, kind: input, shape index: {}]   ;;  %s508_s5 = inlined_call_operand.vmem [shape: f32[8,128], index: 5, kind: output, shape index: {}]  }
   0x1   :  { %11 = vsyncpa [#allocation5], 0  ;;  %s414_s18 = smov [#allocation4]   ;;  %s344_s22 = scalar_lea.hbm %s504_s1, 256 }
   0x2   :  { %s27_s19 = sshll.u32 %s414_s18, 4  ;;  %p345_p0 = scmp.ne.s32.totalorder %s504_s1, %s344_s22  ;;  %s28_s19 = int_to_ptr.vmem [resolvable:$true] %s27_s19 }
   0x3   :  { %p348_p1 = scmp.lt.u32.totalorder %s344_s22, %s504_s1 }
   0x5   :  { %p350_p2 = pnand %p348_p1, %p345_p0 }
   0x7   :  { %353 = shalt.err (!%p350_p2)
}
   0x8   :  { %s354_s27 = scalar_lea.vmem %s28_s19, 256  ;;  %p359_p4 = scmp.lt.s32.totalorder %s28_s19, %s28_s19 }
   0x9   :  { %p355_p3 = scmp.ne.s32.totalorder %s28_s19, %s354_s27  ;;  %p360_p5 = scmp.lt.s32.totalorder %s354_s27, %s354_s27 }
   0xb   :  { %p361_p6 = por %p360_p5, %p359_p4 }
   0xd   :  { %p362_p7 = pnand %p361_p6, %p355_p3 }
   0xf   :  { %365 = shalt.err (!%p362_p7)
}
  0x10   :  { %s415_s28 = smov 128   ;;  %s416_s29 = smov 8  }
  0x11   :  { %33 = dma.hbm_to_vmem [thread:$0]  %s504_s1, 256, %s28_s19, [#allocation5], %s415_s28, %s415_s28, %s416_s29  }
  0x12   :  { %s417_s7 = smov [#allocation2]   ;;  %s418_s9 = smov [#allocation6]  }
  0x13   :  { %s18_s8 = sshll.u32 %s417_s7, 4  ;;  %s41_s10 = sshll.u32 %s418_s9, 4  ;;  %s19_s8 = int_to_ptr.vmem [resolvable:$true] %s18_s8  ;;  %s42_s10 = int_to_ptr.vmem [resolvable:$true] %s41_s10 }
  0x14   :  { %s366_s13 = scalar_lea.hbm %s503_s0, 128 }
  0x15   :  { %p367_p8 = scmp.ne.s32.totalorder %s503_s0, %s366_s13  ;;  %p370_p9 = scmp.lt.u32.totalorder %s366_s13, %s503_s0 }
  0x17   :  { %p372_p10 = pnand %p370_p9, %p367_p8 }
  0x19   :  { %375 = shalt.err (!%p372_p10)
}
  0x1a   :  { %s376_s1 = scalar_lea.vmem %s19_s8, 128  ;;  %p381_p12 = scmp.lt.s32.totalorder %s19_s8, %s19_s8 }
  0x1b   :  { %p377_p11 = scmp.ne.s32.totalorder %s19_s8, %s376_s1  ;;  %p382_p13 = scmp.lt.s32.totalorder %s376_s1, %s376_s1 }
  0x1d   :  { %p383_p0 = por %p382_p13, %p381_p12 }
  0x1f   :  { %p384_p1 = pnand %p383_p0, %p377_p11 }
  0x21   :  { %387 = shalt.err (!%p384_p1)
}
  0x22   :  { %21 = dma.hbm_to_vmem [thread:$0]  %s503_s0, 128, %s19_s8, [#allocation3]  }
  0x23   :  { %s388_s22 = scalar_lea.hbm %s506_s3, 2048 }
  0x24   :  { %p389_p2 = scmp.ne.s32.totalorder %s506_s3, %s388_s22  ;;  %p392_p3 = scmp.lt.u32.totalorder %s388_s22, %s506_s3 }
  0x26   :  { %p394_p4 = pnand %p392_p3, %p389_p2 }
  0x28   :  { %397 = shalt.err (!%p394_p4)
}
  0x29   :  { %s398_s27 = scalar_lea.vmem %s42_s10, 2048  ;;  %p403_p6 = scmp.lt.s32.totalorder %s42_s10, %s42_s10 }
  0x2a   :  { %p399_p5 = scmp.ne.s32.totalorder %s42_s10, %s398_s27  ;;  %p404_p7 = scmp.lt.s32.totalorder %s398_s27, %s398_s27 }
  0x2c   :  { %p405_p8 = por %p404_p7, %p403_p6 }
  0x2e   :  { %p406_p9 = pnand %p405_p8, %p399_p5 }
  0x30   :  { %409 = shalt.err (!%p406_p9)
}
  0x31   :  { %47 = dma.hbm_to_vmem [thread:$0]  %s506_s3, 2048, %s42_s10, [#allocation5], %s415_s28, %s415_s28, %s416_s29  }
  0x32   :  { %410 = dma.done.wait [#allocation3], 128  }
  0x33   :  { %411 = vsyncadd [#allocation3], 4294967168 }
  0x34   :  { %412 = dma.done.wait [#allocation5], 2304  }
  0x35   :  { %413 = vsyncadd [#allocation5], 4294964992  ;;  %v419_v0 = vmov 0.0|0.0   ;;  %vm420_vm0 = vmmov 0   ;;  %v421_v1 = vmov 0.0   ;;  %v60_v2 = vld [vmem:[#allocation4] sm:$0xff] }
  0x36   :  { %309 = vmatprep.subr.bf16.mxu0 %v419_v0  ;;  %271 = vmatprep.mubr.msk.f32.mxu0 %vm420_vm0, %v421_v1  ;;  %v61_v3 = vld [vmem:[#allocation4 + $0x8] sm:$0xff]  ;;  %v144_v5 = vld [vmem:[#allocation6] sm:$0xff]  ;;  %v145_v6 = vld [vmem:[#allocation6 + $0x8] sm:$0xff]  ;;  %vm69_vm1 = vcmask 130048  }
  0x37   :  { %312 = vmatprep.subr.bf16.mxu1 %v419_v0  ;;  %306 = vmatprep.mubr.msk.f32.mxu1 %vm420_vm0, %v421_v1  ;;  %v310_v4 = vpack.c.bf16 %v61_v3, %v60_v2  ;;  %v146_v7 = vld [vmem:[#allocation6 + $0x10] sm:$0xff]  ;;  %v313_v8 = vpack.c.bf16 %v145_v6, %v144_v5  ;;  %v147_v9 = vld [vmem:[#allocation6 + $0x18] sm:$0xff]  ;;  %v59_v10 = vld [vmem:[#allocation2] sm:$0xff] }
  0x38   :  { %v316_v11 = vpack.c.bf16 %v147_v9, %v146_v7  ;;  %v148_v12 = vld [vmem:[#allocation6 + $0x20] sm:$0xff]  ;;  %v149_v13 = vld [vmem:[#allocation6 + $0x28] sm:$0xff]  ;;  %v150_v15 = vld [vmem:[#allocation6 + $0x30] sm:$0xff] }
  0x39   :  { %311 = vmatpush3.bf16.msra.mxu0 %v310_v4  ;;  %314 = vmatpush3.bf16.msra.mxu1 %v313_v8  ;;  %v319_v14 = vpack.c.bf16 %v149_v13, %v148_v12  ;;  %v151_v16 = vld [vmem:[#allocation6 + $0x38] sm:$0xff]  ;;  %v152_v18 = vld [vmem:[#allocation6 + $0x40] sm:$0xff]  ;;  %v153_v19 = vld [vmem:[#allocation6 + $0x48] sm:$0xff] }
  0x3a   :  { %315 = vmatprep.subr.bf16.mxu1 %v419_v0  ;;  %v322_v17 = vpack.c.bf16 %v151_v16, %v150_v15  ;;  %v325_v20 = vpack.c.bf16 %v153_v19, %v152_v18  ;;  %v154_v21 = vld [vmem:[#allocation6 + $0x50] sm:$0xff]  ;;  %v155_v22 = vld [vmem:[#allocation6 + $0x58] sm:$0xff]  ;;  %v156_v24 = vld [vmem:[#allocation6 + $0x60] sm:$0xff] }
  0x3b   :  { %v328_v23 = vpack.c.bf16 %v155_v22, %v154_v21  ;;  %v157_v25 = vld [vmem:[#allocation6 + $0x68] sm:$0xff]  ;;  %v158_v27 = vld [vmem:[#allocation6 + $0x70] sm:$0xff]  ;;  %v159_v28 = vld [vmem:[#allocation6 + $0x78] sm:$0xff] }
  0x3c   :  { %272 = vmatmul.mubr.msk.f32.vlgmr.msra.gmra.mrb[0].mxu0 %vm69_vm1, %v59_v10  ;;  %v331_v26 = vpack.c.bf16 %v157_v25, %v156_v24  ;;  %v334_v29 = vpack.c.bf16 %v159_v28, %v158_v27  ;;  %v244_v30 = vld [vmem:[%s505_s2] ss:$0 sm:$0xff] }
  0x3d   :  { %317 = vmatpush3.bf16.msra.mxu1 %v316_v11  ;;  %v246_v35 = vld [vmem:[%s507_s4] ss:$0 sm:$0xff] }
  0x3e   :  { %318 = vmatprep.subr.bf16.mxu1 %v419_v0 }
  0x41   :  { %320 = vmatpush3.bf16.msra.mxu1 %v319_v14 }
  0x42   :  { %321 = vmatprep.subr.bf16.mxu1 %v419_v0 }
  0x45   :  { %323 = vmatpush3.bf16.msra.mxu1 %v322_v17 }
  0x46   :  { %324 = vmatprep.subr.bf16.mxu1 %v419_v0 }
  0x49   :  { %326 = vmatpush3.bf16.msra.mxu1 %v325_v20 }
  0x4a   :  { %327 = vmatprep.subr.bf16.mxu1 %v419_v0 }
  0x4d   :  { %329 = vmatpush3.bf16.msra.mxu1 %v328_v23 }
  0x4e   :  { %330 = vmatprep.subr.bf16.mxu1 %v419_v0 }
  0x51   :  { %332 = vmatpush3.bf16.msra.mxu1 %v331_v26 }
  0x52   :  { %333 = vmatprep.subr.bf16.mxu1 %v419_v0 }
  0x55   :  { %335 = vmatpush3.bf16.msra.mxu1 %v334_v29 }
 0x10f   :  { %v139_v31 = vpop.f32.mrb[0].mxu0 }
 0x110   :  { %v140_v32 = vadd.f32 %v244_v30, %v139_v31  ;;  %v273_v33 = vpop.f32.mrb[1].mxu0 }
 0x112   :  { %v143_v34 = vmax.f32 %v140_v32, 0.0 }
 0x114   :  { %307 = vmatmul.mubr.f32.vlgmr.msra.gmra.mrb[0].mxu1 %v143_v34 }
 0x1e7   :  { %v233_v36 = vpop.f32.mrb[0].mxu1 }
 0x1e8   :  { %v234_v37 = vadd.f32 %v246_v35, %v233_v36  ;;  %v308_v38 = vpop.f32.mrb[1].mxu1 }
 0x1ea   :  { %237 = vst [vmem:[%s508_s5] sm:$0xff] %v234_v37 }
 0x1eb   :  { %242 = vsyncpa [#allocation3], 1 }
 0x1ec   :  { %243 = vsyncpa [#allocation5], 1 }

</bundles_post_ra>
